<compile_context>
chip_gen: v7x
topology: tpu7x:2x2x1
jax: 0.10.0
libtpu: 0.0.40
codegen_flags: <defaults>
</compile_context>

<pallas_src>
import functools

import jax
import jax.numpy as jnp
from jax.experimental import pallas as pl
from jax.experimental.pallas import tpu as pltpu


def _focal_kernel(pred_ref, tgt_ref, sum_ref, cnt_ref, *,
                  gamma, alpha, ignore_index, hw, tile_hw):
    # pred block: (1, C, T) — classes on sublanes, spatial on lanes (lane-dense)
    # tgt block:  (1, 1, T) int32
    x = pred_ref[...].astype(jnp.float32)
    tgt = tgt_ref[...]

    valid = tgt != ignore_index                                   # (1, 1, T)
    if hw % tile_hw != 0:
        # ragged tail: mask lanes past the true H*W extent (pred/tgt there are
        # garbage from the out-of-bounds edge block; `where` below keeps them out)
        j = pl.program_id(1)
        pos = j * tile_hw + jax.lax.broadcasted_iota(jnp.int32, tgt.shape, 2)
        valid = jnp.logical_and(valid, pos < hw)

    safe_t = jnp.where(valid, tgt, 0)                             # (1, 1, T)
    classes = jax.lax.broadcasted_iota(jnp.int32, x.shape, 1)     # (1, C, T)
    t = (classes == safe_t).astype(jnp.float32)                   # one-hot

    # --- transcendental-light sigmoid / BCE pieces -------------------------
    e = jnp.exp(-jnp.abs(x))                  # EUP #1 (reused 3x below)
    log_term = jnp.log1p(e)                   # EUP #2
    inv1pe = pl.reciprocal(1.0 + e, approx=False)   # exact: keeps 1e-5 accuracy
    nonneg = x >= 0.0
    s = jnp.where(nonneg, inv1pe, e * inv1pe)            # sigmoid(x)
    one_minus_s = jnp.where(nonneg, e * inv1pe, inv1pe)  # 1 - sigmoid(x)

    one_minus_pt = one_minus_s * t + s * (1.0 - t)
    if gamma == 2.0:                           # specialize: avoid pow -> exp(log)
        pt_pow = one_minus_pt * one_minus_pt
    elif gamma == 1.0:
        pt_pow = one_minus_pt
    elif gamma == 0.0:
        pt_pow = jnp.ones_like(one_minus_pt)
    else:
        pt_pow = one_minus_pt ** gamma
    focal_w = (alpha * t + (1.0 - alpha) * (1.0 - t)) * pt_pow

    # numerically-stable BCE with logits: max(x,0) - x*t + log1p(exp(-|x|))
    bce = jnp.maximum(x, 0.0) - x * t + log_term

    loss = jnp.where(valid, bce * focal_w, 0.0)           # (1, C, T)

    part_sum = jnp.sum(loss)                                # one reduce per tile
    part_cnt = jnp.sum(valid.astype(jnp.float32))

    # lane-dense (1,1,8,128) output block; the scalar partial lives at [...,0,0]
    r = jax.lax.broadcasted_iota(jnp.int32, (1, 1, 8, 128), 2)
    c = jax.lax.broadcasted_iota(jnp.int32, (1, 1, 8, 128), 3)
    at00 = jnp.logical_and(r == 0, c == 0)
    sum_ref[...] = jnp.where(at00, part_sum, 0.0)
    cnt_ref[...] = jnp.where(at00, part_cnt, 0.0)


def focal_loss(pred_nchw, target_nhw, *, gamma=2.0, alpha=0.5,
               reduction="mean", loss_weight=1.0, ignore_index=255,
               tile_hw=8192):
    """Sigmoid focal loss matching the PyTorch FocalLoss.forward()."""
    # TODO(synk): list-valued (per-class) alpha is not implemented; scalar only.
    N, C, H, W = pred_nchw.shape
    hw = H * W

    # Native layout, zero-copy views: (N, C, HW) logits, (N, 1, HW) labels.
    pred3 = pred_nchw.reshape(N, C, hw)
    tgt3 = target_nhw.reshape(N, 1, hw).astype(jnp.int32)

    # Lane tile: multiple of 128, capped so one pred block stays <= 4 MiB
    # (double-buffered inputs then fit even v5e's 16 MiB default scoped VMEM
    # and v7x's 64 MiB physical VMEM with lots of headroom).
    max_block_bytes = 4 * 1024 * 1024
    vmem_cap = max(128, (max_block_bytes // (C * 4)) // 128 * 128)
    hw_ceil = pl.cdiv(hw, 128) * 128
    tile = max(128, min((tile_hw // 128) * 128, vmem_cap, hw_ceil))
    num_tiles = pl.cdiv(hw, tile)

    kernel = functools.partial(
        _focal_kernel, gamma=float(gamma), alpha=float(alpha),
        ignore_index=int(ignore_index), hw=int(hw), tile_hw=int(tile))

    part_shape = jax.ShapeDtypeStruct((N, num_tiles, 8, 128), jnp.float32)
    sum_parts, cnt_parts = pl.pallas_call(
        kernel,
        out_shape=(part_shape, part_shape),
        grid_spec=pltpu.PrefetchScalarGridSpec(
            num_scalar_prefetch=0,
            grid=(N, num_tiles),
            in_specs=[
                pl.BlockSpec((1, C, tile), lambda n, j: (n, 0, j)),
                pl.BlockSpec((1, 1, tile), lambda n, j: (n, 0, j)),
            ],
            out_specs=[
                pl.BlockSpec((1, 1, 8, 128), lambda n, j: (n, j, 0, 0)),
                pl.BlockSpec((1, 1, 8, 128), lambda n, j: (n, j, 0, 0)),
            ],
        ),
        compiler_params=pltpu.CompilerParams(
            dimension_semantics=("parallel", "parallel"),
            vmem_limit_bytes=32 * 1024 * 1024),
    )(pred3, tgt3)

    loss_sum = jnp.sum(sum_parts)
    valid_cnt = jnp.sum(cnt_parts)

    if reduction == "mean":
        val = loss_sum / jnp.maximum(valid_cnt * C, 1.0)
    else:  # 'sum'
        val = loss_sum
    val = jnp.where(valid_cnt > 0, val, 0.0)   # no valid targets -> 0.0
    return loss_weight * val


def _reference_focal_loss(pred_nchw, target_nhw, gamma=2.0, alpha=0.5,
                          loss_weight=1.0, ignore_index=255):
    """Pure-JAX reference mirroring the PyTorch module (mean reduction)."""
    N, C = pred_nchw.shape[0], pred_nchw.shape[1]
    pred = jnp.transpose(pred_nchw, (1, 0, 2, 3)).reshape(C, -1).T
    tgt = target_nhw.reshape(-1)
    valid = tgt != ignore_index
    safe_t = jnp.where(valid, tgt, 0)
    t = jax.nn.one_hot(safe_t, C, dtype=jnp.float32)
    s = jax.nn.sigmoid(pred)
    one_minus_pt = (1 - s) * t + s * (1 - t)
    focal_w = (alpha * t + (1 - alpha) * (1 - t)) * one_minus_pt ** gamma
    bce = jnp.maximum(pred, 0.0) - pred * t + jnp.log1p(jnp.exp(-jnp.abs(pred)))
    loss = bce * focal_w * valid[:, None].astype(jnp.float32)
    nvalid = jnp.sum(valid.astype(jnp.float32))
    return loss_weight * jnp.where(
        nvalid > 0, jnp.sum(loss) / jnp.maximum(nvalid * C, 1.0), 0.0)


if __name__ == "__main__":
    key = jax.random.PRNGKey(0)
    k1, k2, k3 = jax.random.split(key, 3)

    # primary check: (2, 4, 16, 16) logits, labels with some ignore_index
    N, C, H, W = 2, 4, 16, 16
    pred = jax.random.normal(k1, (N, C, H, W), dtype=jnp.float32)
    target = jax.random.randint(k2, (N, H, W), 0, C, dtype=jnp.int32)
    ignore_mask = jax.random.uniform(k3, (N, H, W)) < 0.1
    target = jnp.where(ignore_mask, 255, target)

    out = jax.block_until_ready(focal_loss(pred, target, gamma=2.0, alpha=0.5,
                                           loss_weight=1.0, ignore_index=255))
    ref = _reference_focal_loss(pred, target)
    assert jnp.allclose(out, ref, atol=1e-5, rtol=1e-4), (out, ref)

    # ragged spatial extent (H*W not a multiple of 128) exercises the in-kernel
    # tail mask instead of any host-side padding of the logits.
    H2 = W2 = 10
    pred2 = jax.random.normal(k1, (N, C, H2, W2), dtype=jnp.float32)
    target2 = jax.random.randint(k2, (N, H2, W2), 0, C, dtype=jnp.int32)
    out2 = jax.block_until_ready(focal_loss(pred2, target2))
    ref2 = _reference_focal_loss(pred2, target2)
    assert jnp.allclose(out2, ref2, atol=1e-5, rtol=1e-4), (out2, ref2)

    print("KERNEL_OK")
</pallas_src>

<mosaic_0001>
module attributes {stable_mosaic.version = 11 : i64} {
  func.func @_focal_kernel(%arg0: i32, %arg1: i32, %arg2: memref<1x4x256xf32, #tpu.memory_space<vmem>>, %arg3: memref<1x1x256xi32, #tpu.memory_space<vmem>>, %arg4: memref<1x1x8x128xf32, #tpu.memory_space<vmem>>, %arg5: memref<1x1x8x128xf32, #tpu.memory_space<vmem>>) attributes {dimension_semantics = [#tpu.dimension_semantics<parallel>, #tpu.dimension_semantics<parallel>], iteration_bounds = array<i64: 2, 1>, scalar_prefetch = 0 : i64, scratch_operands = 0 : i64, tpu.core_type = #tpu.core_type<tc>, window_params = [{transform_indices = @transform_0, window_bounds = array<i64: 1, 4, 256>}, {transform_indices = @transform_1, window_bounds = array<i64: 1, 1, 256>}, {transform_indices = @transform_2, window_bounds = array<i64: 1, 1, 8, 128>}, {transform_indices = @transform_3, window_bounds = array<i64: 1, 1, 8, 128>}]} {
    %c0 = arith.constant 0 : index
    %c0_0 = arith.constant 0 : index
    %c0_1 = arith.constant 0 : index
    %0 = vector.load %arg2[%c0, %c0_0, %c0_1] : memref<1x4x256xf32, #tpu.memory_space<vmem>>, vector<1x4x256xf32>
    %c0_2 = arith.constant 0 : index
    %c0_3 = arith.constant 0 : index
    %c0_4 = arith.constant 0 : index
    %1 = vector.load %arg3[%c0_2, %c0_3, %c0_4] : memref<1x1x256xi32, #tpu.memory_space<vmem>>, vector<1x1x256xi32>
    %c255_i32 = arith.constant 255 : i32
    %2 = vector.broadcast %c255_i32 : i32 to vector<1x1x256xi32>
    %3 = arith.cmpi ne, %1, %2 : vector<1x1x256xi32>
    %c0_i32 = arith.constant 0 : i32
    %4 = vector.broadcast %c0_i32 : i32 to vector<1x1x256xi32>
    %5 = arith.select %3, %1, %4 : vector<1x1x256xi1>, vector<1x1x256xi32>
    %6 = tpu.iota {dimensions = array<i32: 1>} : vector<1x4x256xi32>
    %7 = vector.broadcast %5 : vector<1x1x256xi32> to vector<1x4x256xi32>
    %8 = arith.cmpi eq, %6, %7 : vector<1x4x256xi32>
    %9 = arith.extui %8 : vector<1x4x256xi1> to vector<1x4x256xi32>
    %10 = arith.sitofp %9 : vector<1x4x256xi32> to vector<1x4x256xf32>
    %11 = math.absf %0 : vector<1x4x256xf32>
    %cst = arith.constant 0.000000e+00 : f32
    %12 = vector.broadcast %cst : f32 to vector<1x4x256xf32>
    %13 = arith.subf %12, %11 : vector<1x4x256xf32>
    %14 = math.exp %13 : vector<1x4x256xf32>
    %15 = math.log1p %14 : vector<1x4x256xf32>
    %cst_5 = arith.constant 1.000000e+00 : f32
    %16 = vector.broadcast %cst_5 : f32 to vector<1x4x256xf32>
    %17 = arith.addf %16, %14 : vector<1x4x256xf32>
    %18 = tpu.reciprocal %17 : vector<1x4x256xf32> -> vector<1x4x256xf32>
    %cst_6 = arith.constant 0.000000e+00 : f32
    %19 = vector.broadcast %cst_6 : f32 to vector<1x4x256xf32>
    %20 = arith.cmpf oge, %0, %19 : vector<1x4x256xf32>
    %21 = arith.mulf %14, %18 : vector<1x4x256xf32>
    %22 = arith.select %20, %18, %21 : vector<1x4x256xi1>, vector<1x4x256xf32>
    %23 = arith.mulf %14, %18 : vector<1x4x256xf32>
    %24 = arith.select %20, %23, %18 : vector<1x4x256xi1>, vector<1x4x256xf32>
    %25 = arith.mulf %24, %10 : vector<1x4x256xf32>
    %cst_7 = arith.constant 1.000000e+00 : f32
    %26 = vector.broadcast %cst_7 : f32 to vector<1x4x256xf32>
    %27 = arith.subf %26, %10 : vector<1x4x256xf32>
    %28 = arith.mulf %22, %27 : vector<1x4x256xf32>
    %29 = arith.addf %25, %28 : vector<1x4x256xf32>
    %30 = arith.mulf %29, %29 : vector<1x4x256xf32>
    %cst_8 = arith.constant 5.000000e-01 : f32
    %31 = vector.broadcast %cst_8 : f32 to vector<1x4x256xf32>
    %32 = arith.mulf %31, %10 : vector<1x4x256xf32>
    %cst_9 = arith.constant 1.000000e+00 : f32
    %33 = vector.broadcast %cst_9 : f32 to vector<1x4x256xf32>
    %34 = arith.subf %33, %10 : vector<1x4x256xf32>
    %cst_10 = arith.constant 5.000000e-01 : f32
    %35 = vector.broadcast %cst_10 : f32 to vector<1x4x256xf32>
    %36 = arith.mulf %35, %34 : vector<1x4x256xf32>
    %37 = arith.addf %32, %36 : vector<1x4x256xf32>
    %38 = arith.mulf %37, %30 : vector<1x4x256xf32>
    %cst_11 = arith.constant 0.000000e+00 : f32
    %39 = vector.broadcast %cst_11 : f32 to vector<1x4x256xf32>
    %40 = arith.maximumf %0, %39 : vector<1x4x256xf32>
    %41 = arith.mulf %0, %10 : vector<1x4x256xf32>
    %42 = arith.subf %40, %41 : vector<1x4x256xf32>
    %43 = arith.addf %42, %15 : vector<1x4x256xf32>
    %44 = arith.mulf %43, %38 : vector<1x4x256xf32>
    %cst_12 = arith.constant 0.000000e+00 : f32
    %45 = vector.shape_cast %3 : vector<1x1x256xi1> to vector<1x1x256xi1>
    %46 = vector.broadcast %45 : vector<1x1x256xi1> to vector<1x4x256xi1>
    %47 = vector.broadcast %cst_12 : f32 to vector<1x4x256xf32>
    %48 = arith.select %46, %44, %47 : vector<1x4x256xi1>, vector<1x4x256xf32>
    %49 = vector.shape_cast %48 : vector<1x4x256xf32> to vector<1x1x4x256xf32>
    %cst_13 = arith.constant dense<0.000000e+00> : vector<1xf32>
    %50 = vector.multi_reduction <add>, %49, %cst_13 [1, 2, 3] : vector<1x1x4x256xf32> to vector<1xf32>
    %51 = vector.shape_cast %50 : vector<1xf32> to vector<1x1x1x1xf32>
    %52 = vector.extract %51[0, 0, 0, 0] : f32 from vector<1x1x1x1xf32>
    %53 = arith.extui %3 : vector<1x1x256xi1> to vector<1x1x256xi32>
    %54 = arith.sitofp %53 : vector<1x1x256xi32> to vector<1x1x256xf32>
    %55 = vector.shape_cast %54 : vector<1x1x256xf32> to vector<1x1x1x256xf32>
    %cst_14 = arith.constant dense<0.000000e+00> : vector<1xf32>
    %56 = vector.multi_reduction <add>, %55, %cst_14 [1, 2, 3] : vector<1x1x1x256xf32> to vector<1xf32>
    %57 = vector.shape_cast %56 : vector<1xf32> to vector<1x1x1x1xf32>
    %58 = vector.extract %57[0, 0, 0, 0] : f32 from vector<1x1x1x1xf32>
    %59 = tpu.iota {dimensions = array<i32: 2>} : vector<1x1x8x128xi32>
    %60 = tpu.iota {dimensions = array<i32: 3>} : vector<1x1x8x128xi32>
    %c0_i32_15 = arith.constant 0 : i32
    %61 = vector.broadcast %c0_i32_15 : i32 to vector<1x1x8x128xi32>
    %62 = arith.cmpi eq, %59, %61 : vector<1x1x8x128xi32>
    %c0_i32_16 = arith.constant 0 : i32
    %63 = vector.broadcast %c0_i32_16 : i32 to vector<1x1x8x128xi32>
    %64 = arith.cmpi eq, %60, %63 : vector<1x1x8x128xi32>
    %65 = arith.andi %62, %64 : vector<1x1x8x128xi1>
    %cst_17 = arith.constant 0.000000e+00 : f32
    %66 = vector.broadcast %52 : f32 to vector<1x1x8x128xf32>
    %67 = vector.broadcast %cst_17 : f32 to vector<1x1x8x128xf32>
    %68 = arith.select %65, %66, %67 : vector<1x1x8x128xi1>, vector<1x1x8x128xf32>
    %c0_18 = arith.constant 0 : index
    %c0_19 = arith.constant 0 : index
    %c0_20 = arith.constant 0 : index
    %c0_21 = arith.constant 0 : index
    %69 = vector.load %arg4[%c0_18, %c0_19, %c0_20, %c0_21] : memref<1x1x8x128xf32, #tpu.memory_space<vmem>>, vector<1x1x8x128xf32>
    tpu.vector_store %arg4[%c0_18, %c0_19, %c0_20, %c0_21], %68 {strides = array<i32>} : memref<1x1x8x128xf32, #tpu.memory_space<vmem>>, vector<1x1x8x128xf32>,
    %cst_22 = arith.constant 0.000000e+00 : f32
    %70 = vector.broadcast %58 : f32 to vector<1x1x8x128xf32>
    %71 = vector.broadcast %cst_22 : f32 to vector<1x1x8x128xf32>
    %72 = arith.select %65, %70, %71 : vector<1x1x8x128xi1>, vector<1x1x8x128xf32>
    %c0_23 = arith.constant 0 : index
    %c0_24 = arith.constant 0 : index
    %c0_25 = arith.constant 0 : index
    %c0_26 = arith.constant 0 : index
    %73 = vector.load %arg5[%c0_23, %c0_24, %c0_25, %c0_26] : memref<1x1x8x128xf32, #tpu.memory_space<vmem>>, vector<1x1x8x128xf32>
    tpu.vector_store %arg5[%c0_23, %c0_24, %c0_25, %c0_26], %72 {strides = array<i32>} : memref<1x1x8x128xf32, #tpu.memory_space<vmem>>, vector<1x1x8x128xf32>,
    return
  }
  func.func @transform_0(%arg0: i32, %arg1: i32) -> (i32, i32, i32) {
    %c0_i32 = arith.constant 0 : i32
    %c0_i32_0 = arith.constant 0 : i32
    return %arg0, %c0_i32, %arg1 : i32, i32, i32
  }
  func.func @transform_1(%arg0: i32, %arg1: i32) -> (i32, i32, i32) {
    %c0_i32 = arith.constant 0 : i32
    %c0_i32_0 = arith.constant 0 : i32
    return %arg0, %c0_i32, %arg1 : i32, i32, i32
  }
  func.func @transform_2(%arg0: i32, %arg1: i32) -> (i32, i32, i32, i32) {
    %c0_i32 = arith.constant 0 : i32
    %c0_i32_0 = arith.constant 0 : i32
    %c0_i32_1 = arith.constant 0 : i32
    return %arg0, %arg1, %c0_i32, %c0_i32_0 : i32, i32, i32, i32
  }
  func.func @transform_3(%arg0: i32, %arg1: i32) -> (i32, i32, i32, i32) {
    %c0_i32 = arith.constant 0 : i32
    %c0_i32_0 = arith.constant 0 : i32
    %c0_i32_1 = arith.constant 0 : i32
    return %arg0, %arg1, %c0_i32, %c0_i32_0 : i32, i32, i32, i32
  }
}

</mosaic_0001>

<bundles_post_ra>
// kernel: tpu_custom_call.1
= control target key start
LH: loop header
LB: loop body
LE: loop exit
PB: predicated region body
PF: predicated region fallthrough
CT: control target
= control target key end

     0   :  { %9 = vsyncpa [#allocation3], 0  ;;  %s1177_s0 = inlined_call_operand.hbm [shape: f32[2,4,256], index: 0, kind: input, shape index: {}]   ;;  %s1178_s1 = inlined_call_operand.hbm [shape: s32[2,1,256], index: 1, kind: input, shape index: {}]   ;;  %s1179_s2 = inlined_call_operand.hbm [shape: f32[2,1,8,128], index: 2, kind: output, shape index: {0}]   ;;  %s1180_s3 = inlined_call_operand.hbm [shape: f32[2,1,8,128], index: 3, kind: output, shape index: {1}]  }
   0x1   :  { %11 = vsyncpa [#allocation3 + $0x1], 0 }
   0x2   :  { %12 = vsyncpa [#allocation6], 0 }
   0x3   :  { %14 = vsyncpa [#allocation6 + $0x1], 0 }
   0x4   :  { %15 = vsyncpa [#allocation4], 0 }
   0x5   :  { %17 = vsyncpa [#allocation4 + $0x1], 0 }
   0x6   :  { %18 = vsyncpa [#allocation9], 0 }
   0x7   :  { %20 = vsyncpa [#allocation9 + $0x1], 0  ;;  %s891_s12 = smov 0   ;;  %s893_s13 = smov 0  }
   0x8   :  { %s895_s14 = smov 0   ;;  %s897_s15 = smov 0  }
   0x9   :  { %s899_s16 = smov 0   ;;  %s901_s17 = smov 0  }
   0xa LB: > { %s575_s18 = sadd.s32 4294967295, %s863_s17   ;;  %s576_s19 = sadd.s32 4294967294, %s863_s17   ;;  %s863_s17 = sphi %s901_s17, %s26_s17   ;;  %s859_s16 = sphi %s899_s16, %s1202_s16   ;;  %s855_s15 = sphi %s897_s15, %s1201_s15   ;;  %s851_s14 = sphi %s895_s14, %s1200_s14   ;;  %s847_s13 = sphi %s893_s13, %s1199_s13   ;;  %s843_s12 = sphi %s891_s12, %s1198_s12  }
   0xb   : > { %s38_s20 = sadd.s32 1, %s859_s16  ;;  %s47_s21 = sadd.s32 1, %s851_s14 }
   0xc   : > { %p40_p0 = scmp.ge.s32.totalorder %s38_s20, 2  ;;  %p54_p1 = scmp.ne.s32.totalorder %s851_s14, %s847_s13 }
   0xd   : > { %p55_p2 = scmp.eq.s32.totalorder %s863_s17, 0  ;;  %p60_p3 = scmp.ne.s32.totalorder %s847_s13, %s843_s12 }
   0xe   : > { %s1204_s20 = smov (%p40_p0, %s38_s20), 0  ;;  %p61_p5 = scmp.eq.s32.totalorder %s575_s18, 0 }
   0xf   : > { %p932_p4 = por %p55_p2, %p54_p1  ;;  %s42_s23 = ssub.s32 %s859_s16, %s1204_s20 }
  0x10   : > { %p114_p6 = scmp.eq.s32.totalorder %s575_s18, 1  ;;  %p45_p7 = scmp.eq.s32.totalorder %s42_s23, 0 }
  0x11   : > { %p938_p8 = por %p61_p5, %p60_p3  ;;  %p120_p10 = scmp.eq.s32.totalorder %s576_s19, 1 }
  0x12   : > { %p942_p9 = por %p114_p6, %p54_p1  ;;  %p627_p13 = scmp.lt.s32.totalorder %s863_s17, 2 }
  0x13   : > { %s1184_s24 = scalar_select %p938_p8, 1, 0 }
  0x14   : > { %s1185_s25 = scalar_select %p942_p9, 1, 0 }
  0x15   : > { %s947_s26 = scalar_select %p45_p7, %s851_s14, %s47_s21  }
  0x16   : > { %p949_p11 = por %p120_p10, %p60_p3  ;;  %s956_s28 = sand.u32 1, %s851_s14  }
  0x17   : > { %s579_s29 = sshll.u32 %s956_s28, 3  ;;  %s599_s30 = sshll.u32 %s859_s16, 7 }
  0x18   : > { %s1186_s27 = scalar_select %p949_p11, 1, 0 }
  0x19   : > { %s963_s6 = scalar_lea.hbm %s1177_s0, %s599_s30  ;;  %s172_s7 = scalar_lea.vmem [#allocation2], %s579_s29 }
  0x1a   : > { %s182_s8 = sshll.u32 %s172_s7, 4  ;;  %p969_p0 = pnand %p627_p13, %p932_p4  ;;  %s965_s8 = int_to_ptr.vmem [resolvable:$true] %s182_s8 }
  0x1b   : > { %s169_s10 = scalar_lea.sflag [#allocation3], %s956_s28  ;;  %s685_s11 = scalar_lea.hbm %s963_s6, 128 }
  0x1c   : > { %p686_p3 = scmp.ne.s32.totalorder %s963_s6, %s685_s11  ;;  %p687_p5 = pneg %p969_p0 }
  0x1d   : > { %s690_s21 = scalar_lea.hbm %s1177_s0, 256  ;;  %p691_p4 = scmp.lt.u32.totalorder %s963_s6, %s1177_s0 }
  0x1e   : > { %p688_p6 = pnand %p687_p5, %p686_p3  ;;  %p692_p10 = scmp.lt.u32.totalorder %s690_s21, %s685_s11 }
  0x1f   : > { %p694_p12 = scmp.lt.u32.totalorder %s685_s11, %s963_s6 }
  0x20   : > { %p689_p7 = pneg %p688_p6  ;;  %p693_p13 = por %p692_p10, %p691_p4 }
  0x22   : > { %p695_p1 = por %p694_p12, %p693_p13 }
  0x24   : > { %p696_p2 = pnand %p695_p1, %p689_p7 }
  0x26   : > { %699 = shalt.err (!%p696_p2)
}
  0x27   : > { %s700_s29 = scalar_lea.vmem %s965_s8, 128  ;;  %s865_s30 = smov [#allocation2]  }
  0x28   : > { %p701_p3 = scmp.ne.s32.totalorder %s965_s8, %s700_s29  ;;  %s705_s4 = sshll.u32 %s865_s30, 4  ;;  %s706_s4 = int_to_ptr.vmem [resolvable:$false] %s705_s4 }
  0x29   : > { %s707_s5 = scalar_lea.vmem %s706_s4, 256  ;;  %p708_p9 = scmp.lt.s32.totalorder %s965_s8, %s706_s4 }
  0x2a   : > { %p703_p6 = pnand %p701_p3, %p687_p5  ;;  %p709_p4 = scmp.lt.s32.totalorder %s707_s5, %s700_s29 }
  0x2c   : > { %p704_p11 = pneg %p703_p6  ;;  %p710_p10 = por %p709_p4, %p708_p9 }
  0x2e   : > { %p711_p12 = pnand %p710_p10, %p704_p11 }
  0x30   : > { %714 = shalt.err (!%p711_p12)
}
  0x31   : > { %616 = dma.hbm_to_vmem [thread:$0]  (!%p969_p0), %s963_s6, 128, %s965_s8, %s169_s10  }
  0x32   : > { %p1188_p1 = scmp.lt.s32.totalorder %s863_s17, 3  ;;  %p1189_p2 = scmp.ge.s32.totalorder %s863_s17, 1 }
  0x33   : > { %s582_s11 = sshll.u32 %s956_s28, 1  ;;  %s600_s18 = sshll.u32 %s859_s16, 5 }
  0x34   : > { %p1005_p7 = pnand %p1189_p2, %p1188_p1  ;;  %s1014_s22 = scalar_lea.hbm %s1178_s1, %s600_s18 }
  0x35   : > { %s193_s23 = scalar_lea.vmem [#allocation5], %s582_s11  ;;  %s190_s6 = scalar_lea.sflag [#allocation6], %s956_s28 }
  0x36   : > { %s1190_s7 = scalar_select %p1005_p7, 1, 0 }
  0x37   : > { %s203_s29 = sshll.u32 %s193_s23, 4  ;;  %s715_s8 = scalar_lea.hbm %s1014_s22, 32  ;;  %s204_s29 = int_to_ptr.vmem [resolvable:$true] %s203_s29 }
  0x38   : > { %p716_p9 = scmp.ne.s32.totalorder %s1014_s22, %s715_s8  ;;  %s720_s4 = scalar_lea.hbm %s1178_s1, 64 }
  0x39   : > { %p721_p3 = scmp.lt.u32.totalorder %s1014_s22, %s1178_s1  ;;  %p722_p6 = scmp.lt.u32.totalorder %s720_s4, %s715_s8 }
  0x3a   : > { %p718_p11 = pnand %p716_p9, %p687_p5  ;;  %p724_p10 = scmp.lt.u32.totalorder %s715_s8, %s1014_s22 }
  0x3b   : > { %p723_p4 = por %p722_p6, %p721_p3 }
  0x3c   : > { %p719_p13 = pneg %p718_p11 }
  0x3d   : > { %p725_p12 = por %p724_p10, %p723_p4 }
  0x3f   : > { %p726_p1 = pnand %p725_p12, %p719_p13 }
  0x41   : > { %729 = shalt.err (!%p726_p1)
}
  0x42   : > { %s730_s28 = scalar_lea.vmem %s204_s29, 32  ;;  %s866_s11 = smov [#allocation5]  }
  0x43   : > { %p731_p2 = scmp.ne.s32.totalorder %s204_s29, %s730_s28  ;;  %s735_s19 = sshll.u32 %s866_s11, 4  ;;  %s736_s19 = int_to_ptr.vmem [resolvable:$false] %s735_s19 }
  0x44   : > { %s737_s21 = scalar_lea.vmem %s736_s19, 64  ;;  %p738_p8 = scmp.lt.s32.totalorder %s204_s29, %s736_s19 }
  0x45   : > { %p733_p9 = pnand %p731_p2, %p687_p5  ;;  %p739_p7 = scmp.lt.s32.totalorder %s737_s21, %s730_s28 }
  0x47   : > { %p734_p11 = pneg %p733_p9  ;;  %p740_p3 = por %p739_p7, %p738_p8 }
  0x49   : > { %p741_p6 = pnand %p740_p3, %p734_p11 }
  0x4b   : > { %744 = shalt.err (!%p741_p6)
}
  0x4c   : > { %619 = dma.hbm_to_vmem [thread:$0]  (!%p969_p0), %s1014_s22, 32, %s204_s29, %s190_s6  }
  0x4d   : > { %p1191_p13 = scmp.ne.s32.totalorder %s1190_s7, 0 }
  0x4e   : > { %s1039_s23 = sand.u32 (!%p1191_p13), 1, %s847_s13   ;;  %p1192_p8 = scmp.ne.s32.totalorder (!%p1191_p13), %s1184_s24, 0 }
  0x4f   : > { %212 = sbr.rel (%p1191_p13) target bundleno = 393 (0x189), region = 28  ;;  %s1042_s8 = sshll.u32 (!%p1191_p13), %s1039_s23, 3 }
  0x50   : > { %s215_s10 = scalar_lea.sflag (!%p1191_p13), [#allocation3], %s1039_s23  ;;  %s218_s30 = scalar_lea.vmem (!%p1191_p13), [#allocation2], %s1042_s8 }
  0x56   : > { %826 = dma.done.wait (%p1192_p8), %s215_s10, 128  }
  0x57   : > { %828 = vsyncadd (%p1192_p8), %s215_s10, 4294967168  ;;  %s587_s9 = sshll.u32 %s1039_s23, 1  ;;  %s224_s7 = scalar_lea.sflag [#allocation6], %s1039_s23 }
  0x58   : > { %s227_s22 = scalar_lea.vmem [#allocation5], %s587_s9 }
  0x59   : > { %830 = dma.done.wait (%p1192_p8), %s224_s7, 32  }
  0x5a   : > { %832 = vsyncadd (%p1192_p8), %s224_s7, 4294967264  ;;  %v262_v0 = vld [vmem:[%s218_s30] sm:$0xff]  ;;  %v266_v3 = vlaneseq  ;;  %v263_v5 = vld [vmem:[%s227_s22] sm:$0x3]  ;;  %v867_v14 = vmov 0.0   ;;  %v868_v44 = vmov 0  }
  0x5b   : > { %v282_v1 = vand.u32 2147483647, %v262_v0  ;;  %vm264_vm0 = vcmp.ne.s32.totalorder %v263_v5, 255  ;;  %vm297_vm3 = vcmp.ge.f32.partialorder %v262_v0, 0.0  ;;  %v326_v32 = vmax.f32 %v262_v0, 0.0  ;;  %s595_s24 = sshll.u32 %s855_s15, 7 }
  0x5c   : > { %v1057_v6 = vshrl.u32 %v266_v3, 7  ;;  %v265_v9 = vsel %vm264_vm0, %v263_v5, 0  ;;  %v335_v45 = vsel %vm264_vm0, 1, %v868_v44  ;;  %v592_v54 = vsel %vm264_vm0, 1.0, %v867_v14  ;;  %s252_s29 = scalar_lea.vmem [#allocation7], %s1042_s8  ;;  %s259_s5 = scalar_lea.vmem [#allocation8], %s1042_s8 }
  0x5d   : > { %v283_v2 = vsub.f32 0.0, %v282_v1  ;;  %vm351_vm6 = vcmask 1043456   ;;  %vm376_vm8 = vcmask 1040384   ;;  %s420_s6 = sshll.u32 %s252_s29, 4  ;;  %s434_s18 = sshll.u32 %s259_s5, 4  ;;  %s1094_s6 = int_to_ptr.vmem [resolvable:$true] %s420_s6  ;;  %s1103_s18 = int_to_ptr.vmem [resolvable:$true] %s434_s18 }
  0x5e   : > { %v1060_v7 = vsub.s32 0, %v1057_v6  ;;  %v1063_v8 = vsub.s32 1, %v1057_v6  ;;  %vm391_vm9 = vcmp.eq.s32.totalorder %v1057_v6, 0  ;;  %s1092_s19 = scalar_lea.hbm %s1179_s2, %s595_s24  ;;  %s1099_s10 = scalar_lea.hbm %s1180_s3, %s595_s24 }
  0x5f   : > { %v284_v4 = vmul.f32 1.442695, %v283_v2  ;;  %s401_s9 = scalar_lea.sflag [#allocation4], %s1039_s23  ;;  %s745_s7 = scalar_lea.vmem %s1094_s6, 128 }
  0x60   : > { %v271_v11 = vrot.slane %v265_v9, %v1060_v7  ;;  %v275_v12 = vrot.slane %v265_v9, %v1063_v8  ;;  %v339_v49 = vrot.slane %v335_v45, %v1060_v7  ;;  %v343_v52 = vrot.slane %v335_v45, %v1063_v8  ;;  %p746_p0 = scmp.ne.s32.totalorder %s1094_s6, %s745_s7  ;;  %p1195_p5 = scmp.ne.s32.totalorder %s1185_s25, 0 }
  0x61   : > { %679 = vpow2.f32 %v284_v4  ;;  %v369_v56 = vrot.slane %v592_v54, %v1060_v7  ;;  %v373_v57 = vrot.slane %v592_v54, %v1063_v8  ;;  %s869_s22 = smov [#allocation7]  }
  0x62   : > { %vm276_vm1 = vcmp.eq.s32.totalorder %v1057_v6, %v271_v11  ;;  %vm277_vm2 = vcmp.eq.s32.totalorder %v1057_v6, %v275_v12  ;;  %vm344_vm5 = vcmp.eq.s32.totalorder %v339_v49, 1  ;;  %vm345_vm7 = vcmp.eq.s32.totalorder %v343_v52, 1  ;;  %p747_p7 = pnand %p746_p0, %p1195_p5 }
  0x63   : > { %v590_v15 = vsel %vm276_vm1, 1.0, %v867_v14  ;;  %v591_v16 = vsel %vm277_vm2, 1.0, %v867_v14  ;;  %v377_v63 = vsel %vm376_vm8, %v369_v56, 0.0 }
  0x64   : > { %v306_v17 = vsub.f32 1.0, %v590_v15  ;;  %v307_v18 = vsub.f32 1.0, %v591_v16  ;;  %v303_v21 = vcombine.low %v590_v15, %v591_v16  ;;  %v315_v27 = vmul.f32 0.5, %v590_v15  ;;  %p748_p4 = pneg %p747_p7 }
  0x65   : > { %v316_v31 = vmul.f32 0.5, %v591_v16 }
  0x66   : > { %v310_v22 = vcombine.low %v306_v17, %v307_v18  ;;  %v317_v28 = vmul.f32 0.5, %v306_v17  ;;  %v318_v35 = vmul.f32 0.5, %v307_v18  ;;  %v327_v36 = vmul.f32 %v303_v21, %v262_v0 }
  0x67   : > { %v378_v0 = vsel %vm376_vm8, %v373_v57, 0.0 }
  0x68   : > { %v319_v40 = vadd.f32 %v317_v28, %v315_v27  ;;  %v320_v42 = vadd.f32 %v318_v35, %v316_v31  ;;  %v328_v43 = vsub.f32 %v326_v32, %v327_v36  ;;  %v379_v2 = vadd.f32 %v378_v0, %v377_v63 }
  0x6b   : > { %v680_v10 = vpop.eup %679 }
  0x6c   : > { %v286_v13 = vadd.f32 1.0, %v680_v10  ;;  %v289_v19 = vmul.f32 -0.5, %v680_v10  ;;  %v292_v26 = vand.u32 2147483647, %v680_v10 }
  0x6e   : > { %681 = vrcp.f32 %v286_v13  ;;  %v290_v23 = vadd.f32 1.0, %v289_v19  ;;  %vm293_vm4 = vcmp.lt.f32.partialorder %v292_v26, 0.0004427343  ;;  %v390_v19 = vand.u32 127, %v266_v3 }
  0x6f   : > { %683 = vlog2.f32 %v286_v13 }
  0x70   : > { %v291_v38 = vmul.f32 %v680_v10, %v290_v23  ;;  %vm392_vm10 = vcmp.eq.s32.totalorder %v390_v19, 0 }
  0x71   : > { %vm1078_vm11 = vmand %vm391_vm9, %vm392_vm10 }
  0x78   : > { %v682_v20 = vpop.eup %681 }
  0x79   : > { %v298_v24 = vmul.f32 %v682_v20, %v680_v10  ;;  %v684_v25 = vpop.eup %683 }
  0x7a   : > { %v288_v37 = vmul.f32 0.6931472, %v684_v25 }
  0x7b   : > { %v299_v29 = vsel %vm297_vm3, %v682_v20, %v298_v24  ;;  %v300_v30 = vsel %vm297_vm3, %v298_v24, %v682_v20 }
  0x7c   : > { %v305_v33 = vmul.f32 %v303_v21, %v300_v30  ;;  %v312_v34 = vmul.f32 %v310_v22, %v299_v29  ;;  %v294_v46 = vsel %vm293_vm4, %v291_v38, %v288_v37 }
  0x7d   : > { %v329_v51 = vadd.f32 %v328_v43, %v294_v46 }
  0x7e   : > { %v313_v39 = vadd.f32 %v312_v34, %v305_v33 }
  0x80   : > { %v314_v41 = vmul.f32 %v313_v39, %v313_v39 }
  0x82   : > { %v322_v47 = vcombine.high %v314_v41, %v314_v41  ;;  %v324_v48 = vmul.f32 %v319_v40, %v314_v41 }
  0x84   : > { %v325_v50 = vmul.f32 %v322_v47, %v320_v42 }
  0x86   : > { %v332_v53 = vcombine.low %v324_v48, %v325_v50 }
  0x88   : > { %v334_v55 = vmul.f32 %v332_v53, %v329_v51 }
  0x8a   : > { %v347_v58 = vcombine.high %v334_v55, %v334_v55  ;;  %v349_v59 = vsel %vm344_vm5, %v334_v55, 0.0 }
  0x8b   : > { %v352_v60 = vsel %vm351_vm6, %v349_v59, 0.0 }
  0x8c   : > { %v350_v61 = vsel %vm345_vm7, %v347_v58, 0.0 }
  0x8d   : > { %v353_v62 = vsel %vm351_vm6, %v350_v61, 0.0 }
  0x8e   : > { %v354_v1 = vadd.f32 %v353_v62, %v352_v60 }
  0x90   : > { %355 = vadd.xlane.f32.xlu0 %v354_v1 }
  0x94   : > { %380 = vadd.xlane.f32.xlu0 %v379_v2 }
 0x11d   : > { %v356_v4 = vpop.xlane.xlu0 %355 }
 0x11e   : > { %v357_v5 = vrot.slane %v356_v4, 4 }
 0x120   : > { %v358_v9 = vadd.f32 %v357_v5, %v356_v4 }
 0x121   : > { %v381_v10 = vpop.xlane.xlu0 %380 }
 0x122   : > { %v359_v11 = vrot.slane %v358_v9, 2  ;;  %v382_v7 = vrot.slane %v381_v10, 4 }
 0x124   : > { %v383_v8 = vadd.f32 %v382_v7, %v381_v10  ;;  %v360_v12 = vadd.f32 %v359_v11, %v358_v9 }
 0x126   : > { %v384_v13 = vrot.slane %v383_v8, 2  ;;  %v361_v14 = vrot.slane %v360_v12, 1 }
 0x128   : > { %v385_v15 = vadd.f32 %v384_v13, %v383_v8  ;;  %v362_v16 = vadd.f32 %v361_v14, %v360_v12 }
 0x12a   : > { %601 = vpush %v362_v16  ;;  %v386_v17 = vrot.slane %v385_v15, 1 }
 0x12c   : > { %v387_v18 = vadd.f32 %v386_v17, %v385_v15 }
 0x12e   : > { %603 = vpush %v387_v18 }
 0x15b   : > { %s602_s4 = spop %601 }
 0x15c   : > { %v394_v21 = vstv %s602_s4  ;;  %s749_s4 = sshll.u32 %s869_s22, 4  ;;  %s750_s4 = int_to_ptr.vmem [resolvable:$false] %s749_s4 }
 0x15d   : > { %v395_v3 = vsel %vm1078_vm11, %v394_v21, 0.0  ;;  %p752_p10 = scmp.lt.s32.totalorder %s1094_s6, %s750_s4 }
 0x15e   : > { %396 = vst [vmem:[%s252_s29] sm:$0xff] %v395_v3  ;;  %s751_s29 = scalar_lea.vmem %s750_s4, 256 }
 0x15f   : > { %s1101_s30 = spop %603  ;;  %p753_p12 = scmp.lt.s32.totalorder %s751_s29, %s745_s7 }
 0x160   : > { %v397_v6 = vstv %s1101_s30 }
 0x161   : > { %p754_p1 = por %p753_p12, %p752_p10 }
 0x163   : > { %p755_p2 = pnand %p754_p1, %p748_p4 }
 0x165   : > { %758 = shalt.err (!%p755_p2)
}
 0x166   : > { %s759_s24 = scalar_lea.hbm %s1092_s19, 128  ;;  %s763_s15 = scalar_lea.hbm %s1179_s2, 256 }
 0x167   : > { %p760_p9 = scmp.ne.s32.totalorder %s1092_s19, %s759_s24  ;;  %p764_p6 = scmp.lt.u32.totalorder %s1092_s19, %s1179_s2 }
 0x168   : > { %p765_p13 = scmp.lt.u32.totalorder %s763_s15, %s759_s24  ;;  %p767_p0 = scmp.lt.u32.totalorder %s759_s24, %s1092_s19 }
 0x169   : > { %p761_p11 = pnand %p760_p9, %p1195_p5 }
 0x16a   : > { %p766_p8 = por %p765_p13, %p764_p6 }
 0x16b   : > { %p762_p3 = pneg %p761_p11 }
 0x16c   : > { %p768_p7 = por %p767_p0, %p766_p8 }
 0x16e   : > { %p769_p4 = pnand %p768_p7, %p762_p3 }
 0x170   : > { %772 = shalt.err (!%p769_p4)
}
 0x171   : > { %609 = dma.vmem_to_hbm [thread:$0]  (%p1195_p5), %s1094_s6, 128, %s1092_s19, %s401_s9   ;;  %v398_v22 = vsel %vm1078_vm11, %v397_v6, 0.0 }
 0x172   : > { %399 = vst [vmem:[%s259_s5] sm:$0xff] %v398_v22  ;;  %s406_s7 = scalar_lea.sflag [#allocation9], %s1039_s23  ;;  %s773_s22 = scalar_lea.vmem %s1103_s18, 128 }
 0x173   : > { %p774_p10 = scmp.ne.s32.totalorder %s1103_s18, %s773_s22  ;;  %s870_s4 = smov [#allocation8]  }
 0x174   : > { %s777_s29 = sshll.u32 %s870_s4, 4  ;;  %s778_s29 = int_to_ptr.vmem [resolvable:$false] %s777_s29 }
 0x175   : > { %p775_p12 = pnand %p774_p10, %p1195_p5  ;;  %s779_s24 = scalar_lea.vmem %s778_s29, 256 }
 0x176   : > { %p780_p2 = scmp.lt.s32.totalorder %s1103_s18, %s778_s29  ;;  %p781_p9 = scmp.lt.s32.totalorder %s779_s24, %s773_s22 }
 0x177   : > { %p776_p1 = pneg %p775_p12 }
 0x178   : > { %p782_p11 = por %p781_p9, %p780_p2 }
 0x17a   : > { %p783_p3 = pnand %p782_p11, %p776_p1 }
 0x17c   : > { %786 = shalt.err (!%p783_p3)
}
 0x17d   : > { %s787_s23 = scalar_lea.hbm %s1099_s10, 128  ;;  %s791_s5 = scalar_lea.hbm %s1180_s3, 256 }
 0x17e   : > { %p788_p6 = scmp.ne.s32.totalorder %s1099_s10, %s787_s23  ;;  %p792_p0 = scmp.lt.u32.totalorder %s1099_s10, %s1180_s3 }
 0x17f   : > { %p793_p7 = scmp.lt.u32.totalorder %s791_s5, %s787_s23  ;;  %p795_p10 = scmp.lt.u32.totalorder %s787_s23, %s1099_s10 }
 0x180   : > { %p789_p13 = pnand %p788_p6, %p1195_p5 }
 0x181   : > { %p794_p4 = por %p793_p7, %p792_p0 }
 0x182   : > { %p790_p8 = pneg %p789_p13 }
 0x183   : > { %p796_p12 = por %p795_p10, %p794_p4 }
 0x185   : > { %p797_p1 = pnand %p796_p12, %p790_p8 }
 0x187   : > { %800 = shalt.err (!%p797_p1)
}
 0x188   : > { %610 = dma.vmem_to_hbm [thread:$0]  (%p1195_p5), %s1103_s18, 128, %s1099_s10, %s406_s7  }
 0x189 PF: > { %s446_s28 = sand.u32 1, %s843_s12   ;;  %p1196_p2 = scmp.ne.s32.totalorder %s1186_s27, 0 }
 0x18a   : > { %p1197_p9 = scmp.ge.s32.totalorder %s863_s17, 2  ;;  %s447_s11 = scalar_lea.sflag [#allocation4], %s446_s28 }
 0x18c   : > { %p621_p11 = pnand %p1197_p9, %p1196_p2 }
 0x18e   : > { %834 = dma.done.wait (!%p621_p11), %s447_s11, 128  }
 0x18f   : > { %836 = vsyncadd (!%p621_p11), %s447_s11, 4294967168  ;;  %s456_s15 = scalar_lea.sflag [#allocation9], %s446_s28 }
 0x190   : > { %838 = dma.done.wait (!%p621_p11), %s456_s15, 128  }
 0x191   : > { %840 = vsyncadd (!%p621_p11), %s456_s15, 4294967168  ;;  %s26_s17 = sadd.s32 1, %s863_s17   ;;  %s1198_s12 = smov %s847_s13 }
 0x192   : > { %p23_p3 = scmp.ge.s32.totalorder %s26_s17, 4   ;;  %s1199_s13 = smov %s851_s14 }
 0x193   : > { %s1200_s14 = smov %s947_s26  ;;  %s1201_s15 = smov %s859_s16 }
 0x194   : > { %s1202_s16 = smov %s1204_s20  ;;  %25 = sbr.rel (!%p23_p3) target bundleno = 10 (0xa), region = 103 }
 0x19b   :  { %461 = vsyncpa [#allocation3], 1 }
 0x19c   :  { %463 = vsyncpa [#allocation3 + $0x1], 1 }
 0x19d   :  { %464 = vsyncpa [#allocation6], 1 }
 0x19e   :  { %466 = vsyncpa [#allocation6 + $0x1], 1 }
 0x19f   :  { %467 = vsyncpa [#allocation4], 1 }
 0x1a0   :  { %469 = vsyncpa [#allocation4 + $0x1], 1 }
 0x1a1   :  { %470 = vsyncpa [#allocation9], 1 }
 0x1a2   :  { %472 = vsyncpa [#allocation9 + $0x1], 1 }

</bundles_post_ra>
